<compile_context>
chip_gen: v7x
topology: tpu7x:2x2x1
jax: 0.10.0
libtpu: 0.0.40
codegen_flags: <defaults>
</compile_context>

<pallas_src>
import functools

import jax
import jax.numpy as jnp
from jax.experimental import pallas as pl
from jax.experimental.pallas import tpu as pltpu

DIMS = (512, 256, 128)   # Actor default: MLP(512, 256, 128)


def _actor_kernel(x_ref, w1_ref, b1_ref, w2_ref, b2_ref, o_ref, *,
                  compute_dtype):
    x = x_ref[...]
    if x.dtype != compute_dtype:
        # In-kernel cast (review item 1): avoids a standalone XLA astype pass
        # over x in HBM; the VPU cast hides under the DMA/MXU.
        x = x.astype(compute_dtype)
    # Layer 1: Linear(512 -> 256) with f32 accumulation on the MXU.
    h = jnp.dot(x, w1_ref[...], preferred_element_type=jnp.float32)
    h = h + b1_ref[...]                                   # (1, 256) broadcast
    # SiLU = h * sigmoid(h); sigmoid via a single exact EUP op (tanh).
    h = h * (0.5 * (jnp.tanh(0.5 * h) + 1.0))
    # Layer 2: Linear(256 -> 128), no activation (last layer).
    h = h.astype(w2_ref.dtype)                            # MXU operand dtype
    y = jnp.dot(h, w2_ref[...], preferred_element_type=jnp.float32)
    y = y + b2_ref[...]
    o_ref[...] = y.astype(o_ref.dtype)


def _pick_batch_tile(batch, compute_dtype):
    # bf16 packs 16 sublanes per vreg -> round small tiles to 16, else 8.
    sub = 16 if jnp.dtype(compute_dtype) == jnp.dtype(jnp.bfloat16) else 8
    if batch >= 2048:
        return 1024                      # many steps; ~2-4 MiB/step, VMEM-safe
    if batch >= 512:
        # Aim for >=2 grid steps so v7x's 2 TensorCores both get work.
        half = (batch + 1) // 2
        return min(1024, ((half + 255) // 256) * 256)
    return max(sub, ((batch + sub - 1) // sub) * sub)     # single padded tile


def actor_forward(x, w1, b1, w2, b2, *, batch_tile=None,
                  compute_dtype=jnp.bfloat16, out_dtype=None):
    """x: [B, 512].  w1: [512, 256], b1: [256], w2: [256, 128], b2: [128].

    Weights are stored pre-transposed ([D_in, D_out]) vs. PyTorch's nn.Linear,
    so the kernel computes x @ W + b with identical semantics.
    """
    B, d_in = x.shape
    d_h = w1.shape[1]
    d_out = w2.shape[1]
    if out_dtype is None:
        out_dtype = x.dtype              # preserve module semantics by default

    tb = batch_tile if batch_tile is not None else _pick_batch_tile(
        B, compute_dtype)
    assert tb % 8 == 0, "batch tile must be a sublane multiple (8)"

    # Weights shipped in compute_dtype (tiny arrays, one-time cast); biases f32.
    w1q = w1 if w1.dtype == compute_dtype else w1.astype(compute_dtype)
    w2q = w2 if w2.dtype == compute_dtype else w2.astype(compute_dtype)
    b1r = b1.astype(jnp.float32).reshape(1, d_h)
    b2r = b2.astype(jnp.float32).reshape(1, d_out)

    # No jnp.pad: Pallas masks the partial last block (row-independent math).
    grid = (pl.cdiv(B, tb),)

    x_bytes = jnp.dtype(x.dtype).itemsize
    w_bytes = jnp.dtype(compute_dtype).itemsize
    cost = pl.CostEstimate(
        flops=2 * B * (d_in * d_h + d_h * d_out),
        transcendentals=B * d_h,                       # one tanh per hidden elem
        bytes_accessed=(B * d_in * x_bytes
                        + B * d_out * jnp.dtype(out_dtype).itemsize
                        + (d_in * d_h + d_h * d_out) * w_bytes
                        + (d_h + d_out) * 4),
    )

    resident = lambda shape: pl.BlockSpec(shape, lambda i: (0, 0))
    in_specs = [
        pl.BlockSpec((tb, d_in), lambda i: (i, 0)),    # streamed x tile
        resident((d_in, d_h)),                         # W1 (VMEM-resident)
        resident((1, d_h)),                            # b1
        resident((d_h, d_out)),                        # W2
        resident((1, d_out)),                          # b2
    ]
    out_specs = pl.BlockSpec((tb, d_out), lambda i: (i, 0))

    fn = pl.pallas_call(
        functools.partial(_actor_kernel, compute_dtype=compute_dtype),
        out_shape=jax.ShapeDtypeStruct((B, d_out), out_dtype),
        grid_spec=pltpu.PrefetchScalarGridSpec(
            num_scalar_prefetch=0,
            grid=grid,
            in_specs=in_specs,
            out_specs=out_specs,
        ),
        compiler_params=pltpu.CompilerParams(
            dimension_semantics=("parallel",),         # megacore on v7x
            vmem_limit_bytes=32 * 1024 * 1024,         # headroom even on v7x (64 MiB)
        ),
        cost_estimate=cost,
    )
    return fn(x, w1q, b1r, w2q, b2r)


def init_actor_params(key, dims=DIMS, dtype=jnp.float32):
    """Deterministic init mimicking nn.Linear (uniform +/- 1/sqrt(fan_in)).

    Weights are returned as [D_in, D_out] (transposed vs. PyTorch)."""
    params = []
    for d_in, d_out in zip(dims[:-1], dims[1:]):
        key, kw, kb = jax.random.split(key, 3)
        bound = 1.0 / (d_in ** 0.5)
        w = jax.random.uniform(kw, (d_in, d_out), dtype, -bound, bound)
        b = jax.random.uniform(kb, (d_out,), dtype, -bound, bound)
        params.append((w, b))
    return params


def _reference_forward(x, params):
    """Pure-JAX f32 reference (same math as the PyTorch module)."""
    h = x
    for i, (w, b) in enumerate(params):
        h = jnp.dot(h, w, precision=jax.lax.Precision.HIGHEST) + b
        if i != len(params) - 1:
            h = h * jax.nn.sigmoid(h)
    return h


if __name__ == "__main__":
    key = jax.random.PRNGKey(0)
    key, kx = jax.random.split(key)

    # Small demo batch.
    B = 8
    x = jax.random.normal(kx, (B, DIMS[0]), dtype=jnp.float32)
    (w1, b1), (w2, b2) = init_actor_params(jax.random.PRNGKey(0))
    params = [(w1, b1), (w2, b2)]
    ref = _reference_forward(x, params)

    # 1) Accurate path (f32 MXU operands, exact SiLU) -> tight tolerance.
    out_f32 = jax.block_until_ready(
        actor_forward(x, w1, b1, w2, b2, compute_dtype=jnp.float32))
    assert out_f32.shape == (B, DIMS[-1]), out_f32.shape
    assert jnp.allclose(out_f32, ref, atol=2e-3, rtol=2e-3), "f32 path mismatch"

    # 2) Default fast path (bf16 operands, f32 accumulation) -> small drift.
    out_bf16 = jax.block_until_ready(actor_forward(x, w1, b1, w2, b2))
    assert out_bf16.shape == (B, DIMS[-1]), out_bf16.shape
    assert jnp.allclose(out_bf16, ref, atol=4e-2, rtol=4e-2), \
        "bf16 path drift too large"

    # 3) Tiled + ragged batch: small tile -> multi-step grid, partial last
    #    block handled by Pallas (no jnp.pad), bf16 output option exercised.
    key, kx2 = jax.random.split(key)
    B2 = 300
    x2 = jax.random.normal(kx2, (B2, DIMS[0]), dtype=jnp.float32)
    out2 = jax.block_until_ready(
        actor_forward(x2, w1, b1, w2, b2, batch_tile=128,
                      out_dtype=jnp.bfloat16))
    ref2 = _reference_forward(x2, params)
    assert out2.shape == (B2, DIMS[-1]), out2.shape
    assert out2.dtype == jnp.bfloat16, out2.dtype
    assert jnp.allclose(out2.astype(jnp.float32), ref2, atol=5e-2, rtol=5e-2), \
        "tiled/ragged path mismatch"

    print("KERNEL_OK")
</pallas_src>

<mosaic_0001>
module attributes {stable_mosaic.version = 11 : i64} {
  func.func @_actor_kernel(%arg0: i32, %arg1: memref<8x512xf32, #tpu.memory_space<vmem>>, %arg2: memref<512x256xf32, #tpu.memory_space<vmem>>, %arg3: memref<1x256xf32, #tpu.memory_space<vmem>>, %arg4: memref<256x128xf32, #tpu.memory_space<vmem>>, %arg5: memref<1x128xf32, #tpu.memory_space<vmem>>, %arg6: memref<8x128xf32, #tpu.memory_space<vmem>>) attributes {dimension_semantics = [#tpu.dimension_semantics<parallel>], iteration_bounds = array<i64: 1>, scalar_prefetch = 0 : i64, scratch_operands = 0 : i64, tpu.core_type = #tpu.core_type<tc>, window_params = [{transform_indices = @transform_0, window_bounds = array<i64: 8, 512>}, {pipeline_mode = #tpu.pipeline_mode<synchronous>, transform_indices = @transform_1, window_bounds = array<i64: 512, 256>}, {pipeline_mode = #tpu.pipeline_mode<synchronous>, transform_indices = @transform_2, window_bounds = array<i64: 1, 256>}, {pipeline_mode = #tpu.pipeline_mode<synchronous>, transform_indices = @transform_3, window_bounds = array<i64: 256, 128>}, {pipeline_mode = #tpu.pipeline_mode<synchronous>, transform_indices = @transform_4, window_bounds = array<i64: 1, 128>}, {transform_indices = @transform_5, window_bounds = array<i64: 8, 128>}]} {
    %c0 = arith.constant 0 : index
    %c0_0 = arith.constant 0 : index
    %0 = vector.load %arg1[%c0, %c0_0] : memref<8x512xf32, #tpu.memory_space<vmem>>, vector<8x512xf32>
    %c0_1 = arith.constant 0 : index
    %c0_2 = arith.constant 0 : index
    %1 = vector.load %arg2[%c0_1, %c0_2] : memref<512x256xf32, #tpu.memory_space<vmem>>, vector<512x256xf32>
    %cst = arith.constant dense<0.000000e+00> : vector<8x256xf32>
    %2 = tpu.matmul %0, %1, %cst {dimension_numbers = #tpu.dot_dimension_numbers<[1], [0], [0], [1], [0, 0, 1, 1], [], []>} : vector<8x512xf32>, vector<512x256xf32>, vector<8x256xf32> -> vector<8x256xf32>
    %c0_3 = arith.constant 0 : index
    %c0_4 = arith.constant 0 : index
    %3 = vector.load %arg3[%c0_3, %c0_4] : memref<1x256xf32, #tpu.memory_space<vmem>>, vector<1x256xf32>
    %4 = vector.broadcast %3 : vector<1x256xf32> to vector<8x256xf32>
    %5 = arith.addf %2, %4 : vector<8x256xf32>
    %cst_5 = arith.constant 5.000000e-01 : f32
    %6 = vector.broadcast %cst_5 : f32 to vector<8x256xf32>
    %7 = arith.mulf %6, %5 : vector<8x256xf32>
    %8 = math.tanh %7 : vector<8x256xf32>
    %cst_6 = arith.constant 1.000000e+00 : f32
    %9 = vector.broadcast %cst_6 : f32 to vector<8x256xf32>
    %10 = arith.addf %8, %9 : vector<8x256xf32>
    %cst_7 = arith.constant 5.000000e-01 : f32
    %11 = vector.broadcast %cst_7 : f32 to vector<8x256xf32>
    %12 = arith.mulf %11, %10 : vector<8x256xf32>
    %13 = arith.mulf %5, %12 : vector<8x256xf32>
    %c0_8 = arith.constant 0 : index
    %c0_9 = arith.constant 0 : index
    %14 = vector.load %arg4[%c0_8, %c0_9] : memref<256x128xf32, #tpu.memory_space<vmem>>, vector<256x128xf32>
    %cst_10 = arith.constant dense<0.000000e+00> : vector<8x128xf32>
    %15 = tpu.matmul %13, %14, %cst_10 {dimension_numbers = #tpu.dot_dimension_numbers<[1], [0], [0], [1], [0, 0, 1, 1], [], []>} : vector<8x256xf32>, vector<256x128xf32>, vector<8x128xf32> -> vector<8x128xf32>
    %c0_11 = arith.constant 0 : index
    %c0_12 = arith.constant 0 : index
    %16 = vector.load %arg5[%c0_11, %c0_12] : memref<1x128xf32, #tpu.memory_space<vmem>>, vector<1x128xf32>
    %17 = vector.broadcast %16 : vector<1x128xf32> to vector<8x128xf32>
    %18 = arith.addf %15, %17 : vector<8x128xf32>
    %c0_13 = arith.constant 0 : index
    %c0_14 = arith.constant 0 : index
    %19 = vector.load %arg6[%c0_13, %c0_14] : memref<8x128xf32, #tpu.memory_space<vmem>>, vector<8x128xf32>
    tpu.vector_store %arg6[%c0_13, %c0_14], %18 {strides = array<i32>} : memref<8x128xf32, #tpu.memory_space<vmem>>, vector<8x128xf32>,
    return
  }
  func.func @transform_0(%arg0: i32) -> (i32, i32) {
    %c0_i32 = arith.constant 0 : i32
    %c0_i32_0 = arith.constant 0 : i32
    return %arg0, %c0_i32 : i32, i32
  }
  func.func @transform_1(%arg0: i32) -> (i32, i32) {
    %c0_i32 = arith.constant 0 : i32
    %c0_i32_0 = arith.constant 0 : i32
    %c0_i32_1 = arith.constant 0 : i32
    return %c0_i32, %c0_i32_0 : i32, i32
  }
  func.func @transform_2(%arg0: i32) -> (i32, i32) {
    %c0_i32 = arith.constant 0 : i32
    %c0_i32_0 = arith.constant 0 : i32
    %c0_i32_1 = arith.constant 0 : i32
    return %c0_i32, %c0_i32_0 : i32, i32
  }
  func.func @transform_3(%arg0: i32) -> (i32, i32) {
    %c0_i32 = arith.constant 0 : i32
    %c0_i32_0 = arith.constant 0 : i32
    %c0_i32_1 = arith.constant 0 : i32
    return %c0_i32, %c0_i32_0 : i32, i32
  }
  func.func @transform_4(%arg0: i32) -> (i32, i32) {
    %c0_i32 = arith.constant 0 : i32
    %c0_i32_0 = arith.constant 0 : i32
    %c0_i32_1 = arith.constant 0 : i32
    return %c0_i32, %c0_i32_0 : i32, i32
  }
  func.func @transform_5(%arg0: i32) -> (i32, i32) {
    %c0_i32 = arith.constant 0 : i32
    %c0_i32_0 = arith.constant 0 : i32
    return %arg0, %c0_i32 : i32, i32
  }
}

</mosaic_0001>

<bundles_post_ra>
// kernel: tpu_custom_call.1
= control target key start
LH: loop header
LB: loop body
LE: loop exit
PB: predicated region body
PF: predicated region fallthrough
CT: control target
= control target key end

     0   :  { %10 = vsyncpa [#allocation3], 0  ;;  %s880_s0 = inlined_call_operand.hbm [shape: f32[8,512], index: 0, kind: input, shape index: {}]   ;;  %s881_s1 = inlined_call_operand.hbm [shape: f32[512,256], index: 1, kind: input, shape index: {}]   ;;  %s882_s2 = inlined_call_operand.vmem [shape: f32[1,256], index: 2, kind: input, shape index: {}]   ;;  %s883_s3 = inlined_call_operand.hbm [shape: f32[256,128], index: 3, kind: input, shape index: {}]   ;;  %s884_s4 = inlined_call_operand.vmem [shape: f32[1,128], index: 4, kind: input, shape index: {}]   ;;  %s885_s5 = inlined_call_operand.hbm [shape: f32[8,128], index: 5, kind: output, shape index: {}]  }
   0x1   :  { %11 = vsyncpa [#allocation6], 0 }
   0x2   :  { %12 = vsyncpa [#allocation4], 0  ;;  %s788_s18 = smov [#allocation5]   ;;  %s694_s22 = scalar_lea.hbm %s881_s1, 16384 }
   0x3   :  { %s28_s19 = sshll.u32 %s788_s18, 4  ;;  %p695_p0 = scmp.ne.s32.totalorder %s881_s1, %s694_s22  ;;  %s29_s19 = int_to_ptr.vmem [resolvable:$true] %s28_s19 }
   0x4   :  { %p698_p1 = scmp.lt.u32.totalorder %s694_s22, %s881_s1 }
   0x6   :  { %p700_p2 = pnand %p698_p1, %p695_p0 }
   0x8   :  { %703 = shalt.err (!%p700_p2)
}
   0x9   :  { %s704_s27 = scalar_lea.vmem %s29_s19, 16384  ;;  %p709_p4 = scmp.lt.s32.totalorder %s29_s19, %s29_s19 }
   0xa   :  { %p705_p3 = scmp.ne.s32.totalorder %s29_s19, %s704_s27  ;;  %p710_p5 = scmp.lt.s32.totalorder %s704_s27, %s704_s27 }
   0xc   :  { %p711_p6 = por %p710_p5, %p709_p4 }
   0xe   :  { %p712_p7 = pnand %p711_p6, %p705_p3 }
  0x10   :  { %715 = shalt.err (!%p712_p7)
}
  0x11   :  { %s789_s28 = smov 256   ;;  %s790_s29 = smov 16  }
  0x12   :  { %34 = dma.hbm_to_vmem [thread:$0]  %s881_s1, 16384, %s29_s19, [#allocation6], %s789_s28, %s789_s28, %s790_s29  }
  0x13   :  { %s791_s7 = smov [#allocation2]   ;;  %s792_s9 = smov [#allocation7]  }
  0x14   :  { %s19_s8 = sshll.u32 %s791_s7, 4  ;;  %s42_s10 = sshll.u32 %s792_s9, 4  ;;  %s20_s8 = int_to_ptr.vmem [resolvable:$true] %s19_s8  ;;  %s43_s10 = int_to_ptr.vmem [resolvable:$true] %s42_s10 }
  0x15   :  { %s716_s13 = scalar_lea.hbm %s880_s0, 512 }
  0x16   :  { %p717_p8 = scmp.ne.s32.totalorder %s880_s0, %s716_s13  ;;  %p720_p9 = scmp.lt.u32.totalorder %s716_s13, %s880_s0 }
  0x18   :  { %p722_p10 = pnand %p720_p9, %p717_p8 }
  0x1a   :  { %725 = shalt.err (!%p722_p10)
}
  0x1b   :  { %s726_s1 = scalar_lea.vmem %s20_s8, 512  ;;  %p731_p12 = scmp.lt.s32.totalorder %s20_s8, %s20_s8 }
  0x1c   :  { %p727_p11 = scmp.ne.s32.totalorder %s20_s8, %s726_s1  ;;  %p732_p13 = scmp.lt.s32.totalorder %s726_s1, %s726_s1 }
  0x1e   :  { %p733_p0 = por %p732_p13, %p731_p12 }
  0x20   :  { %p734_p1 = pnand %p733_p0, %p727_p11 }
  0x22   :  { %737 = shalt.err (!%p734_p1)
}
  0x23   :  { %22 = dma.hbm_to_vmem [thread:$0]  %s880_s0, 512, %s20_s8, [#allocation3]  }
  0x24   :  { %s738_s22 = scalar_lea.hbm %s883_s3, 4096 }
  0x25   :  { %p739_p2 = scmp.ne.s32.totalorder %s883_s3, %s738_s22  ;;  %p742_p3 = scmp.lt.u32.totalorder %s738_s22, %s883_s3 }
  0x27   :  { %p744_p4 = pnand %p742_p3, %p739_p2 }
  0x29   :  { %747 = shalt.err (!%p744_p4)
}
  0x2a   :  { %s748_s27 = scalar_lea.vmem %s43_s10, 4096  ;;  %p753_p6 = scmp.lt.s32.totalorder %s43_s10, %s43_s10 }
  0x2b   :  { %p749_p5 = scmp.ne.s32.totalorder %s43_s10, %s748_s27  ;;  %p754_p7 = scmp.lt.s32.totalorder %s748_s27, %s748_s27 }
  0x2d   :  { %p755_p8 = por %p754_p7, %p753_p6 }
  0x2f   :  { %p756_p9 = pnand %p755_p8, %p749_p5 }
  0x31   :  { %759 = shalt.err (!%p756_p9)
}
  0x32   :  { %s793_s0 = smov 128   ;;  %s794_s28 = smov 8  }
  0x33   :  { %48 = dma.hbm_to_vmem [thread:$0]  %s883_s3, 4096, %s43_s10, [#allocation6], %s793_s0, %s793_s0, %s794_s28  }
  0x34   :  { %782 = dma.done.wait [#allocation3], 512  }
  0x35   :  { %783 = vsyncadd [#allocation3], 4294966784 }
  0x36   :  { %784 = dma.done.wait [#allocation6], 20480  }
  0x37   :  { %785 = vsyncadd [#allocation6], 4294946816  ;;  %v65_v0 = vld [vmem:[#allocation5 + $0x8] sm:$0xff]  ;;  %v67_v1 = vld [vmem:[#allocation5 + $0x18] sm:$0xff]  ;;  %s795_s8 = smov [#allocation8]  }
  0x38   :  { %v64_v2 = vld [vmem:[#allocation5] sm:$0xff]  ;;  %v518_v3 = vpack.c.bf16 %v67_v1, %v65_v0  ;;  %v66_v4 = vld [vmem:[#allocation5 + $0x10] sm:$0xff]  ;;  %v129_v5 = vld [vmem:[#allocation5 + $0x208] sm:$0xff]  ;;  %s472_s9 = sshll.u32 %s795_s8, 4  ;;  %s473_s9 = int_to_ptr.vmem [resolvable:$true] %s472_s9 }
  0x39   :  { %v131_v6 = vld [vmem:[#allocation5 + $0x218] sm:$0xff]  ;;  %v520_v7 = vpack.c.bf16 %v66_v4, %v64_v2  ;;  %v128_v9 = vld [vmem:[#allocation5 + $0x200] sm:$0xff]  ;;  %v130_v10 = vld [vmem:[#allocation5 + $0x210] sm:$0xff]  ;;  %s760_s10 = scalar_lea.vmem %s473_s9, 128  ;;  %p765_p11 = scmp.lt.s32.totalorder %s473_s9, %s473_s9 }
  0x3a   :  { %v582_v8 = vpack.c.bf16 %v131_v6, %v129_v5  ;;  %v69_v11 = vld [vmem:[#allocation5 + $0x28] sm:$0xff]  ;;  %519 = vmatprep.subr.bf16.mxu1 %v518_v3  ;;  %v584_v12 = vpack.c.bf16 %v130_v10, %v128_v9  ;;  %v71_v13 = vld [vmem:[#allocation5 + $0x38] sm:$0xff]  ;;  %v68_v14 = vld [vmem:[#allocation5 + $0x20] sm:$0xff]  ;;  %p761_p10 = scmp.ne.s32.totalorder %s473_s9, %s760_s10  ;;  %p766_p12 = scmp.lt.s32.totalorder %s760_s10, %s760_s10 }
  0x3b   :  { %v70_v15 = vld [vmem:[#allocation5 + $0x30] sm:$0xff]  ;;  %521 = vmatpush1.bf16.msra.mxu1 %v520_v7  ;;  %v522_v16 = vpack.c.bf16 %v71_v13, %v69_v11  ;;  %v133_v18 = vld [vmem:[#allocation5 + $0x228] sm:$0xff]  ;;  %v135_v19 = vld [vmem:[#allocation5 + $0x238] sm:$0xff] }
  0x3c   :  { %583 = vmatprep.subr.bf16.mxu0 %v582_v8  ;;  %v524_v17 = vpack.c.bf16 %v70_v15, %v68_v14  ;;  %v132_v20 = vld [vmem:[#allocation5 + $0x220] sm:$0xff]  ;;  %v586_v21 = vpack.c.bf16 %v135_v19, %v133_v18  ;;  %v134_v22 = vld [vmem:[#allocation5 + $0x230] sm:$0xff]  ;;  %v73_v23 = vld [vmem:[#allocation5 + $0x48] sm:$0xff]  ;;  %p767_p13 = por %p766_p12, %p765_p11 }
  0x3d   :  { %585 = vmatpush1.bf16.msra.mxu0 %v584_v12  ;;  %v75_v24 = vld [vmem:[#allocation5 + $0x58] sm:$0xff]  ;;  %523 = vmatprep.subr.bf16.mxu1 %v522_v16  ;;  %v588_v25 = vpack.c.bf16 %v134_v22, %v132_v20  ;;  %v72_v27 = vld [vmem:[#allocation5 + $0x40] sm:$0xff]  ;;  %v74_v28 = vld [vmem:[#allocation5 + $0x50] sm:$0xff] }
  0x3e   :  { %v526_v26 = vpack.c.bf16 %v75_v24, %v73_v23  ;;  %v137_v29 = vld [vmem:[#allocation5 + $0x248] sm:$0xff]  ;;  %587 = vmatprep.subr.bf16.mxu0 %v586_v21  ;;  %v139_v30 = vld [vmem:[#allocation5 + $0x258] sm:$0xff]  ;;  %v136_v31 = vld [vmem:[#allocation5 + $0x240] sm:$0xff]  ;;  %v528_v33 = vpack.c.bf16 %v74_v28, %v72_v27  ;;  %p768_p0 = pnand %p767_p13, %p761_p10 }
  0x3f   :  { %v138_v32 = vld [vmem:[#allocation5 + $0x250] sm:$0xff]  ;;  %525 = vmatpush1.bf16.msra.mxu1 %v524_v17  ;;  %v590_v34 = vpack.c.bf16 %v139_v30, %v137_v29  ;;  %v77_v35 = vld [vmem:[#allocation5 + $0x68] sm:$0xff]  ;;  %v79_v36 = vld [vmem:[#allocation5 + $0x78] sm:$0xff] }
  0x40   :  { %v76_v37 = vld [vmem:[#allocation5 + $0x60] sm:$0xff]  ;;  %527 = vmatprep.subr.bf16.mxu1 %v526_v26  ;;  %v592_v38 = vpack.c.bf16 %v138_v32, %v136_v31  ;;  %v530_v39 = vpack.c.bf16 %v79_v36, %v77_v35  ;;  %v78_v40 = vld [vmem:[#allocation5 + $0x70] sm:$0xff]  ;;  %v141_v41 = vld [vmem:[#allocation5 + $0x268] sm:$0xff] }
  0x41   :  { %589 = vmatpush1.bf16.msra.mxu0 %v588_v25  ;;  %v143_v42 = vld [vmem:[#allocation5 + $0x278] sm:$0xff]  ;;  %v140_v44 = vld [vmem:[#allocation5 + $0x260] sm:$0xff]  ;;  %v142_v45 = vld [vmem:[#allocation5 + $0x270] sm:$0xff]  ;;  %v532_v48 = vpack.c.bf16 %v78_v40, %v76_v37 }
  0x42   :  { %591 = vmatprep.subr.bf16.mxu0 %v590_v34  ;;  %v594_v43 = vpack.c.bf16 %v143_v42, %v141_v41  ;;  %v81_v46 = vld [vmem:[#allocation5 + $0x88] sm:$0xff]  ;;  %v83_v47 = vld [vmem:[#allocation5 + $0x98] sm:$0xff]  ;;  %v596_v51 = vpack.c.bf16 %v142_v45, %v140_v44  ;;  %v80_v53 = vld [vmem:[#allocation5 + $0x80] sm:$0xff] }
  0x43   :  { %529 = vmatpush1.bf16.msra.mxu1 %v528_v33  ;;  %v145_v49 = vld [vmem:[#allocation5 + $0x288] sm:$0xff]  ;;  %v147_v50 = vld [vmem:[#allocation5 + $0x298] sm:$0xff]  ;;  %v534_v52 = vpack.c.bf16 %v83_v47, %v81_v46  ;;  %v82_v54 = vld [vmem:[#allocation5 + $0x90] sm:$0xff] }
  0x44   :  { %531 = vmatprep.subr.bf16.mxu1 %v530_v39  ;;  %v144_v55 = vld [vmem:[#allocation5 + $0x280] sm:$0xff]  ;;  %v598_v56 = vpack.c.bf16 %v147_v50, %v145_v49  ;;  %v146_v57 = vld [vmem:[#allocation5 + $0x290] sm:$0xff]  ;;  %v85_v58 = vld [vmem:[#allocation5 + $0xa8] sm:$0xff]  ;;  %v536_v62 = vpack.c.bf16 %v82_v54, %v80_v53 }
  0x45   :  { %593 = vmatpush1.bf16.msra.mxu0 %v592_v38  ;;  %v87_v59 = vld [vmem:[#allocation5 + $0xb8] sm:$0xff]  ;;  %v149_v60 = vld [vmem:[#allocation5 + $0x2a8] sm:$0xff]  ;;  %v600_v63 = vpack.c.bf16 %v146_v57, %v144_v55  ;;  %v84_v1 = vld [vmem:[#allocation5 + $0xa0] sm:$0xff] }
  0x46   :  { %595 = vmatprep.subr.bf16.mxu0 %v594_v43  ;;  %v151_v61 = vld [vmem:[#allocation5 + $0x2b8] sm:$0xff]  ;;  %v538_v0 = vpack.c.bf16 %v87_v59, %v85_v58  ;;  %v86_v2 = vld [vmem:[#allocation5 + $0xb0] sm:$0xff]  ;;  %v148_v3 = vld [vmem:[#allocation5 + $0x2a0] sm:$0xff] }
  0x47   :  { %533 = vmatpush1.bf16.msra.mxu1 %v532_v48  ;;  %v602_v4 = vpack.c.bf16 %v151_v61, %v149_v60  ;;  %v150_v5 = vld [vmem:[#allocation5 + $0x2b0] sm:$0xff]  ;;  %v89_v6 = vld [vmem:[#allocation5 + $0xc8] sm:$0xff]  ;;  %v91_v7 = vld [vmem:[#allocation5 + $0xd8] sm:$0xff]  ;;  %v540_v10 = vpack.c.bf16 %v86_v2, %v84_v1 }
  0x48   :  { %535 = vmatprep.subr.bf16.mxu1 %v534_v52  ;;  %v153_v8 = vld [vmem:[#allocation5 + $0x2c8] sm:$0xff]  ;;  %v155_v9 = vld [vmem:[#allocation5 + $0x2d8] sm:$0xff]  ;;  %v604_v11 = vpack.c.bf16 %v150_v5, %v148_v3  ;;  %v542_v12 = vpack.c.bf16 %v91_v7, %v89_v6  ;;  %v88_v13 = vld [vmem:[#allocation5 + $0xc0] sm:$0xff] }
  0x49   :  { %597 = vmatpush1.bf16.msra.mxu0 %v596_v51  ;;  %v90_v14 = vld [vmem:[#allocation5 + $0xd0] sm:$0xff]  ;;  %v152_v15 = vld [vmem:[#allocation5 + $0x2c0] sm:$0xff]  ;;  %v606_v16 = vpack.c.bf16 %v155_v9, %v153_v8  ;;  %v93_v18 = vld [vmem:[#allocation5 + $0xe8] sm:$0xff] }
  0x4a   :  { %599 = vmatprep.subr.bf16.mxu0 %v598_v56  ;;  %v154_v17 = vld [vmem:[#allocation5 + $0x2d0] sm:$0xff]  ;;  %v95_v19 = vld [vmem:[#allocation5 + $0xf8] sm:$0xff]  ;;  %v157_v20 = vld [vmem:[#allocation5 + $0x2e8] sm:$0xff]  ;;  %v544_v22 = vpack.c.bf16 %v90_v14, %v88_v13 }
  0x4b   :  { %537 = vmatpush1.bf16.msra.mxu1 %v536_v62  ;;  %v159_v21 = vld [vmem:[#allocation5 + $0x2f8] sm:$0xff]  ;;  %v608_v23 = vpack.c.bf16 %v154_v17, %v152_v15  ;;  %v546_v24 = vpack.c.bf16 %v95_v19, %v93_v18  ;;  %v92_v25 = vld [vmem:[#allocation5 + $0xe0] sm:$0xff]  ;;  %v94_v26 = vld [vmem:[#allocation5 + $0xf0] sm:$0xff] }
  0x4c   :  { %539 = vmatprep.subr.bf16.mxu1 %v538_v0  ;;  %v156_v27 = vld [vmem:[#allocation5 + $0x2e0] sm:$0xff]  ;;  %v610_v28 = vpack.c.bf16 %v159_v21, %v157_v20  ;;  %v158_v29 = vld [vmem:[#allocation5 + $0x2f0] sm:$0xff]  ;;  %v97_v30 = vld [vmem:[#allocation5 + $0x108] sm:$0xff]  ;;  %v548_v34 = vpack.c.bf16 %v94_v26, %v92_v25 }
  0x4d   :  { %601 = vmatpush1.bf16.msra.mxu0 %v600_v63  ;;  %v99_v31 = vld [vmem:[#allocation5 + $0x118] sm:$0xff]  ;;  %v161_v32 = vld [vmem:[#allocation5 + $0x308] sm:$0xff]  ;;  %v612_v35 = vpack.c.bf16 %v158_v29, %v156_v27  ;;  %v96_v37 = vld [vmem:[#allocation5 + $0x100] sm:$0xff] }
  0x4e   :  { %603 = vmatprep.subr.bf16.mxu0 %v602_v4  ;;  %v163_v33 = vld [vmem:[#allocation5 + $0x318] sm:$0xff]  ;;  %v550_v36 = vpack.c.bf16 %v99_v31, %v97_v30  ;;  %v98_v38 = vld [vmem:[#allocation5 + $0x110] sm:$0xff]  ;;  %v160_v39 = vld [vmem:[#allocation5 + $0x300] sm:$0xff] }
  0x4f   :  { %541 = vmatpush1.bf16.msra.mxu1 %v540_v10  ;;  %v614_v40 = vpack.c.bf16 %v163_v33, %v161_v32  ;;  %v162_v41 = vld [vmem:[#allocation5 + $0x310] sm:$0xff]  ;;  %v101_v42 = vld [vmem:[#allocation5 + $0x128] sm:$0xff]  ;;  %v103_v43 = vld [vmem:[#allocation5 + $0x138] sm:$0xff]  ;;  %v552_v46 = vpack.c.bf16 %v98_v38, %v96_v37 }
  0x50   :  { %543 = vmatprep.subr.bf16.mxu1 %v542_v12  ;;  %v165_v44 = vld [vmem:[#allocation5 + $0x328] sm:$0xff]  ;;  %v167_v45 = vld [vmem:[#allocation5 + $0x338] sm:$0xff]  ;;  %v616_v47 = vpack.c.bf16 %v162_v41, %v160_v39  ;;  %v554_v48 = vpack.c.bf16 %v103_v43, %v101_v42  ;;  %v100_v49 = vld [vmem:[#allocation5 + $0x120] sm:$0xff] }
  0x51   :  { %605 = vmatpush1.bf16.msra.mxu0 %v604_v11  ;;  %v102_v50 = vld [vmem:[#allocation5 + $0x130] sm:$0xff]  ;;  %v164_v51 = vld [vmem:[#allocation5 + $0x320] sm:$0xff]  ;;  %v618_v52 = vpack.c.bf16 %v167_v45, %v165_v44  ;;  %v105_v54 = vld [vmem:[#allocation5 + $0x148] sm:$0xff] }
  0x52   :  { %607 = vmatprep.subr.bf16.mxu0 %v606_v16  ;;  %v166_v53 = vld [vmem:[#allocation5 + $0x330] sm:$0xff]  ;;  %v107_v55 = vld [vmem:[#allocation5 + $0x158] sm:$0xff]  ;;  %v169_v56 = vld [vmem:[#allocation5 + $0x348] sm:$0xff]  ;;  %v556_v58 = vpack.c.bf16 %v102_v50, %v100_v49 }
  0x53   :  { %545 = vmatpush1.bf16.msra.mxu1 %v544_v22  ;;  %v171_v57 = vld [vmem:[#allocation5 + $0x358] sm:$0xff]  ;;  %v620_v59 = vpack.c.bf16 %v166_v53, %v164_v51  ;;  %v558_v60 = vpack.c.bf16 %v107_v55, %v105_v54  ;;  %v104_v61 = vld [vmem:[#allocation5 + $0x140] sm:$0xff]  ;;  %v106_v62 = vld [vmem:[#allocation5 + $0x150] sm:$0xff] }
  0x54   :  { %547 = vmatprep.subr.bf16.mxu1 %v546_v24  ;;  %v168_v63 = vld [vmem:[#allocation5 + $0x340] sm:$0xff]  ;;  %v622_v0 = vpack.c.bf16 %v171_v57, %v169_v56  ;;  %v170_v1 = vld [vmem:[#allocation5 + $0x350] sm:$0xff]  ;;  %v109_v2 = vld [vmem:[#allocation5 + $0x168] sm:$0xff]  ;;  %v560_v6 = vpack.c.bf16 %v106_v62, %v104_v61 }
  0x55   :  { %609 = vmatpush1.bf16.msra.mxu0 %v608_v23  ;;  %v111_v3 = vld [vmem:[#allocation5 + $0x178] sm:$0xff]  ;;  %v173_v4 = vld [vmem:[#allocation5 + $0x368] sm:$0xff]  ;;  %v108_v7 = vld [vmem:[#allocation5 + $0x160] sm:$0xff]  ;;  %v624_v8 = vpack.c.bf16 %v170_v1, %v168_v63 }
  0x56   :  { %611 = vmatprep.subr.bf16.mxu0 %v610_v28  ;;  %v175_v5 = vld [vmem:[#allocation5 + $0x378] sm:$0xff]  ;;  %v562_v9 = vpack.c.bf16 %v111_v3, %v109_v2  ;;  %v110_v10 = vld [vmem:[#allocation5 + $0x170] sm:$0xff]  ;;  %v172_v11 = vld [vmem:[#allocation5 + $0x360] sm:$0xff] }
  0x57   :  { %549 = vmatpush1.bf16.msra.mxu1 %v548_v34  ;;  %v174_v12 = vld [vmem:[#allocation5 + $0x370] sm:$0xff]  ;;  %v626_v13 = vpack.c.bf16 %v175_v5, %v173_v4  ;;  %v113_v14 = vld [vmem:[#allocation5 + $0x188] sm:$0xff]  ;;  %v115_v15 = vld [vmem:[#allocation5 + $0x198] sm:$0xff]  ;;  %v564_v20 = vpack.c.bf16 %v110_v10, %v108_v7 }
  0x58   :  { %551 = vmatprep.subr.bf16.mxu1 %v550_v36  ;;  %v61_v16 = vld [vmem:[#allocation2 + $0x8] sm:$0xff]  ;;  %v179_v18 = vld [vmem:[#allocation5 + $0x398] sm:$0xff]  ;;  %v628_v21 = vpack.c.bf16 %v174_v12, %v172_v11  ;;  %v566_v22 = vpack.c.bf16 %v115_v15, %v113_v14  ;;  %v112_v23 = vld [vmem:[#allocation5 + $0x180] sm:$0xff] }
  0x59   :  { %613 = vmatpush1.bf16.msra.mxu0 %v612_v35  ;;  %v177_v17 = vld [vmem:[#allocation5 + $0x388] sm:$0xff]  ;;  %268 = vmatprep.mubr.f32.mxu1 %v61_v16  ;;  %v63_v19 = vld [vmem:[#allocation2 + $0x18] sm:$0xff]  ;;  %v114_v24 = vld [vmem:[#allocation5 + $0x190] sm:$0xff] }
  0x5a   :  { %615 = vmatprep.subr.bf16.mxu0 %v614_v40  ;;  %339 = vmatprep.mubr.f32.mxu0 %v63_v19  ;;  %v176_v25 = vld [vmem:[#allocation5 + $0x380] sm:$0xff]  ;;  %v630_v26 = vpack.c.bf16 %v179_v18, %v177_v17  ;;  %v178_v27 = vld [vmem:[#allocation5 + $0x390] sm:$0xff]  ;;  %v117_v28 = vld [vmem:[#allocation5 + $0x1a8] sm:$0xff]  ;;  %v568_v32 = vpack.c.bf16 %v114_v24, %v112_v23 }
  0x5b   :  { %553 = vmatpush1.bf16.msra.mxu1 %v552_v46  ;;  %v119_v29 = vld [vmem:[#allocation5 + $0x1b8] sm:$0xff]  ;;  %v181_v30 = vld [vmem:[#allocation5 + $0x3a8] sm:$0xff]  ;;  %v632_v33 = vpack.c.bf16 %v178_v27, %v176_v25  ;;  %v116_v35 = vld [vmem:[#allocation5 + $0x1a0] sm:$0xff] }
  0x5c   :  { %555 = vmatprep.subr.bf16.mxu1 %v554_v48  ;;  %v183_v31 = vld [vmem:[#allocation5 + $0x3b8] sm:$0xff]  ;;  %v570_v34 = vpack.c.bf16 %v119_v29, %v117_v28  ;;  %v118_v36 = vld [vmem:[#allocation5 + $0x1b0] sm:$0xff]  ;;  %v180_v37 = vld [vmem:[#allocation5 + $0x3a0] sm:$0xff] }
  0x5d   :  { %617 = vmatpush1.bf16.msra.mxu0 %v616_v47  ;;  %v634_v38 = vpack.c.bf16 %v183_v31, %v181_v30  ;;  %v182_v39 = vld [vmem:[#allocation5 + $0x3b0] sm:$0xff]  ;;  %v121_v40 = vld [vmem:[#allocation5 + $0x1c8] sm:$0xff]  ;;  %v123_v41 = vld [vmem:[#allocation5 + $0x1d8] sm:$0xff]  ;;  %v572_v44 = vpack.c.bf16 %v118_v36, %v116_v35 }
  0x5e   :  { %619 = vmatprep.subr.bf16.mxu0 %v618_v52  ;;  %v185_v42 = vld [vmem:[#allocation5 + $0x3c8] sm:$0xff]  ;;  %v187_v43 = vld [vmem:[#allocation5 + $0x3d8] sm:$0xff]  ;;  %v636_v45 = vpack.c.bf16 %v182_v39, %v180_v37  ;;  %v574_v46 = vpack.c.bf16 %v123_v41, %v121_v40  ;;  %v120_v47 = vld [vmem:[#allocation5 + $0x1c0] sm:$0xff] }
  0x5f   :  { %557 = vmatpush1.bf16.msra.mxu1 %v556_v58  ;;  %v122_v48 = vld [vmem:[#allocation5 + $0x1d0] sm:$0xff]  ;;  %v184_v49 = vld [vmem:[#allocation5 + $0x3c0] sm:$0xff]  ;;  %v638_v50 = vpack.c.bf16 %v187_v43, %v185_v42  ;;  %v125_v52 = vld [vmem:[#allocation5 + $0x1e8] sm:$0xff] }
  0x60   :  { %559 = vmatprep.subr.bf16.mxu1 %v558_v60  ;;  %v186_v51 = vld [vmem:[#allocation5 + $0x3d0] sm:$0xff]  ;;  %v127_v53 = vld [vmem:[#allocation5 + $0x1f8] sm:$0xff]  ;;  %v189_v54 = vld [vmem:[#allocation5 + $0x3e8] sm:$0xff]  ;;  %v576_v56 = vpack.c.bf16 %v122_v48, %v120_v47 }
  0x61   :  { %621 = vmatpush1.bf16.msra.mxu0 %v620_v59  ;;  %v191_v55 = vld [vmem:[#allocation5 + $0x3f8] sm:$0xff]  ;;  %v640_v57 = vpack.c.bf16 %v186_v51, %v184_v49  ;;  %v578_v58 = vpack.c.bf16 %v127_v53, %v125_v52  ;;  %v124_v59 = vld [vmem:[#allocation5 + $0x1e0] sm:$0xff]  ;;  %v126_v60 = vld [vmem:[#allocation5 + $0x1f0] sm:$0xff]  ;;  %v194_v52 = vlaneseq }
  0x62   :  { %623 = vmatprep.subr.bf16.mxu0 %v622_v0  ;;  %v188_v61 = vld [vmem:[#allocation5 + $0x3e0] sm:$0xff]  ;;  %v642_v62 = vpack.c.bf16 %v191_v55, %v189_v54  ;;  %v190_v63 = vld [vmem:[#allocation5 + $0x3f0] sm:$0xff]  ;;  %v373_v1 = vld [vmem:[#allocation7 + $0x88] sm:$0xff]  ;;  %v580_v2 = vpack.c.bf16 %v126_v60, %v124_v59 }
  0x63   :  { %561 = vmatpush1.bf16.msra.mxu1 %v560_v6  ;;  %v372_v0 = vld [vmem:[#allocation7 + $0x80] sm:$0xff]  ;;  %v644_v3 = vpack.c.bf16 %v190_v63, %v188_v61  ;;  %v357_v6 = vld [vmem:[#allocation7 + $0x8] sm:$0xff]  ;;  %v374_v7 = vld [vmem:[#allocation7 + $0x90] sm:$0xff]  ;;  %v195_v53 = vshrl.u32 %v194_v52, 7 }
  0x64   :  { %563 = vmatprep.subr.bf16.mxu1 %v562_v9  ;;  %v646_v4 = vpack.c.bf16 %v373_v1, %v372_v0  ;;  %v356_v5 = vld [vmem:[#allocation7] sm:$0xff]  ;;  %v62_v11 = vld [vmem:[#allocation2 + $0x10] sm:$0xff]  ;;  %v359_v14 = vld [vmem:[#allocation7 + $0x18] sm:$0xff] }
  0x65   :  { %625 = vmatpush1.bf16.msra.mxu0 %v624_v8  ;;  %v375_v8 = vld [vmem:[#allocation7 + $0x98] sm:$0xff]  ;;  %v60_v9 = vld [vmem:[#allocation2] sm:$0xff]  ;;  %v648_v10 = vpack.c.bf16 %v357_v6, %v356_v5  ;;  %v377_v17 = vld [vmem:[#allocation7 + $0xa8] sm:$0xff]  ;;  %v196_v54 = vsub.s32 0, %v195_v53 }
  0x66   :  { %627 = vmatprep.subr.bf16.mxu0 %v626_v13  ;;  %v650_v12 = vpack.c.bf16 %v375_v8, %v374_v7  ;;  %v358_v13 = vld [vmem:[#allocation7 + $0x10] sm:$0xff]  ;;  %v376_v16 = vld [vmem:[#allocation7 + $0xa0] sm:$0xff]  ;;  %v379_v23 = vld [vmem:[#allocation7 + $0xb8] sm:$0xff] }
  0x67   :  { %565 = vmatpush1.bf16.msra.mxu1 %v564_v20  ;;  %v652_v15 = vpack.c.bf16 %v359_v14, %v358_v13  ;;  %v654_v18 = vpack.c.bf16 %v377_v17, %v376_v16  ;;  %v360_v19 = vld [vmem:[#allocation7 + $0x20] sm:$0xff]  ;;  %v361_v20 = vld [vmem:[#allocation7 + $0x28] sm:$0xff]  ;;  %v362_v25 = vld [vmem:[#allocation7 + $0x30] sm:$0xff] }
  0x68   :  { %567 = vmatprep.subr.bf16.mxu1 %v566_v22  ;;  %v378_v22 = vld [vmem:[#allocation7 + $0xb0] sm:$0xff]  ;;  %v380_v28 = vld [vmem:[#allocation7 + $0xc0] sm:$0xff]  ;;  %v381_v29 = vld [vmem:[#allocation7 + $0xc8] sm:$0xff] }
  0x69   :  { %629 = vmatpush1.bf16.msra.mxu0 %v628_v21  ;;  %v656_v21 = vpack.c.bf16 %v361_v20, %v360_v19  ;;  %v658_v24 = vpack.c.bf16 %v379_v23, %v378_v22  ;;  %v662_v30 = vpack.c.bf16 %v381_v29, %v380_v28  ;;  %v364_v31 = vld [vmem:[#allocation7 + $0x40] sm:$0xff]  ;;  %v383_v35 = vld [vmem:[#allocation7 + $0xd8] sm:$0xff]  ;;  %v366_v37 = vld [vmem:[#allocation7 + $0x50] sm:$0xff] }
  0x6a   :  { %631 = vmatprep.subr.bf16.mxu0 %v630_v26  ;;  %v363_v26 = vld [vmem:[#allocation7 + $0x38] sm:$0xff]  ;;  %v384_v40 = vld [vmem:[#allocation7 + $0xe0] sm:$0xff]  ;;  %v385_v41 = vld [vmem:[#allocation7 + $0xe8] sm:$0xff] }
  0x6b   :  { %569 = vmatpush1.bf16.msra.mxu1 %v568_v32  ;;  %v660_v27 = vpack.c.bf16 %v363_v26, %v362_v25  ;;  %v365_v32 = vld [vmem:[#allocation7 + $0x48] sm:$0xff]  ;;  %v670_v42 = vpack.c.bf16 %v385_v41, %v384_v40  ;;  %v368_v43 = vld [vmem:[#allocation7 + $0x60] sm:$0xff]  ;;  %v387_v47 = vld [vmem:[#allocation7 + $0xf8] sm:$0xff] }
  0x6c   :  { %571 = vmatprep.subr.bf16.mxu1 %v570_v34  ;;  %v382_v34 = vld [vmem:[#allocation7 + $0xd0] sm:$0xff]  ;;  %v192_v55 = vld [vmem:[%s882_s2] sm:$0x3] }
  0x6d   :  { %633 = vmatpush1.bf16.msra.mxu0 %v632_v33  ;;  %v664_v33 = vpack.c.bf16 %v365_v32, %v364_v31  ;;  %v666_v36 = vpack.c.bf16 %v383_v35, %v382_v34  ;;  %v370_v49 = vld [vmem:[#allocation7 + $0x70] sm:$0xff]  ;;  %v482_v14 = vld [vmem:[%s884_s4] ss:$0 sm:$0xff] }
  0x6e   :  { %635 = vmatprep.subr.bf16.mxu0 %v634_v38  ;;  %v367_v38 = vld [vmem:[#allocation7 + $0x58] sm:$0xff] }
  0x6f   :  { %573 = vmatpush1.bf16.msra.mxu1 %v572_v44  ;;  %v668_v39 = vpack.c.bf16 %v367_v38, %v366_v37  ;;  %v369_v44 = vld [vmem:[#allocation7 + $0x68] sm:$0xff] }
  0x70   :  { %575 = vmatprep.subr.bf16.mxu1 %v574_v46  ;;  %v386_v46 = vld [vmem:[#allocation7 + $0xf0] sm:$0xff] }
  0x71   :  { %637 = vmatpush1.bf16.msra.mxu0 %v636_v45  ;;  %v672_v45 = vpack.c.bf16 %v369_v44, %v368_v43  ;;  %v674_v48 = vpack.c.bf16 %v387_v47, %v386_v46 }
  0x72   :  { %639 = vmatprep.subr.bf16.mxu0 %v638_v50  ;;  %v371_v50 = vld [vmem:[#allocation7 + $0x78] sm:$0xff] }
  0x73   :  { %577 = vmatpush1.bf16.msra.mxu1 %v576_v56  ;;  %v676_v51 = vpack.c.bf16 %v371_v50, %v370_v49  ;;  %v200_v56 = vsub.s32 1, %v195_v53 }
  0x74   :  { %579 = vmatprep.subr.bf16.mxu1 %v578_v58 }
  0x75   :  { %641 = vmatpush1.bf16.msra.mxu0 %v640_v57  ;;  %v197_v57 = vrot.slane %v192_v55, %v196_v54  ;;  %v201_v58 = vrot.slane %v192_v55, %v200_v56 }
  0x76   :  { %643 = vmatprep.subr.bf16.mxu0 %v642_v62 }
  0x77   :  { %581 = vmatpush1.bf16.msra.mxu1 %v580_v2 }
  0x78   :  { %647 = vmatprep.subr.bf16.mxu1 %v646_v4 }
  0x79   :  { %645 = vmatpush1.bf16.msra.mxu0 %v644_v3 }
  0x7a   :  { %269 = vmatmul.mubr.f32.vlgmr.msra.gmra.mrb[0].mxu1 %v60_v9 }
  0x7b   :  { %649 = vmatpush3.bf16.msra.mxu1 %v648_v10 }
  0x7c   :  { %340 = vmatmul.mubr.f32.vlgmr.msra.gmra.mrb[0].mxu0 %v62_v11  ;;  %651 = vmatprep.subr.bf16.mxu1 %v650_v12 }
  0x7f   :  { %653 = vmatpush3.bf16.msra.mxu1 %v652_v15 }
  0x80   :  { %655 = vmatprep.subr.bf16.mxu1 %v654_v18 }
  0x83   :  { %657 = vmatpush3.bf16.msra.mxu1 %v656_v21 }
  0x84   :  { %659 = vmatprep.subr.bf16.mxu1 %v658_v24 }
  0x87   :  { %661 = vmatpush3.bf16.msra.mxu1 %v660_v27 }
  0x88   :  { %663 = vmatprep.subr.bf16.mxu1 %v662_v30 }
  0x8b   :  { %665 = vmatpush3.bf16.msra.mxu1 %v664_v33 }
  0x8c   :  { %667 = vmatprep.subr.bf16.mxu1 %v666_v36 }
  0x8f   :  { %669 = vmatpush3.bf16.msra.mxu1 %v668_v39 }
  0x90   :  { %671 = vmatprep.subr.bf16.mxu1 %v670_v42 }
  0x93   :  { %673 = vmatpush3.bf16.msra.mxu1 %v672_v45 }
  0x94   :  { %675 = vmatprep.subr.bf16.mxu1 %v674_v48 }
  0x97   :  { %677 = vmatpush3.bf16.msra.mxu1 %v676_v51 }
 0x14d   :  { %v270_v59 = vpop.f32.mrb[0].mxu1 }
 0x14e   :  { %v271_v60 = vadd.f32 %v270_v59, %v197_v57  ;;  %v272_v61 = vpop.f32.mrb[1].mxu1 }
 0x14f   :  { %v341_v62 = vpop.f32.mrb[0].mxu0  ;;  %v273_v63 = vadd.f32 %v272_v61, %v201_v58 }
 0x150   :  { %v343_v0 = vpop.f32.mrb[1].mxu0  ;;  %v342_v1 = vadd.f32 %v341_v62, %v271_v60 }
 0x151   :  { %v344_v2 = vadd.f32 %v343_v0, %v273_v63 }
 0x152   :  { %v346_v3 = vmul.f32 0.5, %v342_v1 }
 0x153   :  { %v347_v4 = vmul.f32 0.5, %v344_v2 }
 0x154   :  { %690 = vtanh.f32 %v346_v3 }
 0x155   :  { %692 = vtanh.f32 %v347_v4 }
 0x15e   :  { %v691_v5 = vpop.eup %690 }
 0x15f   :  { %v693_v6 = vpop.eup %692  ;;  %v350_v7 = vadd.f32 1.0, %v691_v5 }
 0x160   :  { %v351_v8 = vadd.f32 1.0, %v693_v6 }
 0x161   :  { %v352_v9 = vmul.f32 0.5, %v350_v7 }
 0x162   :  { %v353_v10 = vmul.f32 0.5, %v351_v8 }
 0x163   :  { %v354_v12 = vmul.f32 %v352_v9, %v342_v1 }
 0x164   :  { %v355_v11 = vmul.f32 %v353_v10, %v344_v2 }
 0x166   :  { %459 = vmatprep.mubr.f32.mxu1 %v355_v11 }
 0x167   :  { %460 = vmatmul.mubr.f32.vlgmr.msra.gmra.mrb[2].mxu1 %v354_v12 }
 0x23a   :  { %v515_v13 = vpop.f32.mrb[2].mxu1 }
 0x23b   :  { %v516_v15 = vpop.f32.mrb[3].mxu1 }
 0x23c   :  { %v517_v16 = vadd.f32 %v516_v15, %v515_v13 }
 0x23e   :  { %v462_v17 = vadd.f32 %v517_v16, %v482_v14 }
 0x240   :  { %465 = vst [vmem:[#allocation8] sm:$0xff] %v462_v17 }
 0x241   :  { %771 = shalt.err (!%p768_p0)
}
 0x242   :  { %s772_s13 = scalar_lea.hbm %s885_s5, 128 }
 0x243   :  { %p773_p1 = scmp.ne.s32.totalorder %s885_s5, %s772_s13  ;;  %p776_p2 = scmp.lt.u32.totalorder %s772_s13, %s885_s5 }
 0x245   :  { %p778_p3 = pnand %p776_p2, %p773_p1 }
 0x247   :  { %781 = shalt.err (!%p778_p3)
}
 0x248   :  { %475 = dma.vmem_to_hbm [thread:$0]  %s473_s9, 128, %s885_s5, [#allocation4]  }
 0x249   :  { %786 = dma.done.wait [#allocation4], 128  }
 0x24a   :  { %787 = vsyncadd [#allocation4], 4294967168 }
 0x24b   :  { %479 = vsyncpa [#allocation3], 1 }
 0x24c   :  { %480 = vsyncpa [#allocation6], 1 }
 0x24d   :  { %481 = vsyncpa [#allocation4], 1 }

</bundles_post_ra>
